<compile_context>
chip_gen: v5e
topology: v5e:2x2
jax: 0.10.0
libtpu: 0.0.40
codegen_flags: <defaults>
</compile_context>

<pallas_src>
import functools

import jax
import jax.numpy as jnp
from jax import lax
from jax.experimental import pallas as pl
from jax.experimental.pallas import tpu as pltpu


_LANE_PAD = 128                         # vreg lane width on all generations
_VMEM_LIMIT_BYTES = 48 * 1024 * 1024    # <= v7x 64 MiB physical; above v5e/v6e scoped defaults
_VMEM_SLACK_BYTES = 12 * 1024 * 1024    # outputs, scratch, Mosaic internal scratch
_MAX_IMG_BUFFER_BYTES = 8 * 1024 * 1024  # per pipeline buffer (x2 double-buffered)
_MIN_IMG_BUFFER_BYTES = 512 * 1024
_CHUNK_VREG_BUDGET = 128 * 1024         # bound on the (D, chunk) f32 intermediate (vreg file = 256 KiB)


def _round_up(n, m):
    return ((n + m - 1) // m) * m


def _round_down(n, m):
    return (n // m) * m


def _sublane(dtype_bytes):
    # sublane tile: 8 for 4-byte dtypes, 16 for 2-byte (bf16 packing)
    return 8 * (4 // dtype_bytes)


def _padded_bytes_2d(rows, cols, dtype_bytes):
    """VMEM footprint of a 2-D array after (sublane, 128) tile padding."""
    return (_round_up(max(rows, 1), _sublane(dtype_bytes))
            * _round_up(max(cols, 1), 128) * dtype_bytes)


def _plan_spatial_tiling(hw, c, dtype_bytes, d, img_buffer_budget, chunk=None):
    """Pick (tile, chunk, n_full_chunks, rem_chunk).

    tile:  spatial positions DMA'd per grid step (HBM->VMEM block width).
           Sized from a VMEM-bytes budget (accounting for sublane padding of
           the C axis) so each strip is MB-scale, a multiple of `chunk` where
           possible, and a divisor of hw.
    chunk: spatial positions processed per inner compute pass, bounded so the
           (D, chunk) f32 intermediate stays within the vreg file.
    """
    if chunk is None:
        d_pad = _round_up(max(d, 1), 8)
        chunk = _round_down(max(_CHUNK_VREG_BUDGET // (d_pad * 4), 128), 128)
        chunk = max(128, min(chunk, 2048))

    c_pad = _round_up(max(c, 1), _sublane(dtype_bytes))
    tile_cap = max(chunk,
                   _round_down(img_buffer_budget // (c_pad * dtype_bytes), 128))

    if hw % 128 != 0 or hw <= tile_cap:
        # Full-extent block (always a legal BlockSpec shape).
        # TODO(synk): very large images whose H*W is not a multiple of 128 are
        # taken in a single block; pad + mask would be needed to tile those.
        tile = hw
    else:
        tile = None
        # Prefer chunk-aligned divisors of hw, then any 128-aligned divisor.
        for step in (chunk, 128):
            start = _round_down(tile_cap, step)
            for t in range(start, 0, -step):
                if hw % t == 0:
                    tile = t
                    break
            if tile is not None:
                break
        if tile is None:
            tile = hw

    n_full, rem = divmod(tile, chunk)
    return tile, chunk, n_full, rem


def _fused_kernel(x_ref, w_enc_ref, b_enc_ref, w_heads_ref, b_heads_ref,
                  w2_ref, b2_ref, simple_ref, nuc_ref, acc_ref,
                  *, s_pad, inv_hw, chunk, n_full, rem):
    """Fused encoder + attribute heads.

    Per grid step (b, s):
      x_ref:       (C, tile)                spatial tile of image b (NCHW order)
      w_enc_ref:   (D, C), b_enc_ref (D, 1) synthetic 1x1-conv encoder (pre-T)
      w_heads_ref: (D, s_pad + 256), b_heads_ref (1, s_pad + 256)
                   [ all plain Linear heads | nucleus-MLP layer 1 ]
      w2_ref:      (256, n_pad), b2_ref (1, n_pad)   nucleus-MLP layer 2
      simple_ref:  (1, s_pad)   logits of all plain Linear heads (lane-padded)
      nuc_ref:     (1, n_pad)   nucleus-shape logits (lane-padded)
      acc_ref:     (D, 1) VMEM scratch — running spatial sum of ReLU'd conv
    """
    hw_step = pl.program_id(1)

    @pl.when(hw_step == 0)
    def _init():
        acc_ref[...] = jnp.zeros_like(acc_ref)

    d = acc_ref.shape[0]

    # ---- encoder: 1x1 conv + ReLU on this spatial tile, partial sum --------
    # The image tile is consumed in its natural (C-sublane, spatial-lane)
    # layout; the transpose lives on the tiny constant operand (w_enc stored
    # as (D, C)), so there is no per-step layout shuffle of the big operand.
    # The tile is swept in lane-chunks so the (D, chunk) f32 intermediate
    # stays vreg-resident even when the DMA tile is multi-MB.
    def _chunk_sum(start, width):
        xc = x_ref[:, pl.ds(start, width)]                         # (C, width)
        h = jnp.dot(w_enc_ref[...], xc,
                    preferred_element_type=jnp.float32)            # (D, width)
        h = jnp.maximum(h + b_enc_ref[...], 0.0)                   # bias (D, 1)
        return jnp.sum(h, axis=1, keepdims=True)                   # (D, 1)

    partial = jnp.zeros((d, 1), jnp.float32)
    if n_full > 0:
        def body(i, carry):
            start = pl.multiple_of(i * chunk, 128)
            return carry + _chunk_sum(start, chunk)
        partial = lax.fori_loop(0, n_full, body, partial,
                                unroll=min(n_full, 8))
    if rem > 0:
        partial = partial + _chunk_sum(n_full * chunk, rem)
    acc_ref[...] += partial

    # ---- heads: run once per image, on its last spatial tile ---------------
    @pl.when(hw_step == pl.num_programs(1) - 1)
    def _heads():
        feat = acc_ref[...] * inv_hw                # global-average pool (D, 1)
        # One MXU matmul covering every plain Linear head + nucleus layer 1.
        # Transposed-LHS contraction, but the transpose is on the tiny (D, 1)
        # feature vector and runs once per image.
        g = lax.dot_general(feat, w_heads_ref[...],
                            dimension_numbers=(((0,), (0,)), ((), ())),
                            preferred_element_type=jnp.float32)    # (1, W)
        g = g + b_heads_ref[...]
        simple_ref[...] = g[:, :s_pad]
        h1 = jnp.maximum(g[:, s_pad:], 0.0)
        # TODO(synk): nn.Dropout is implemented as inference-mode identity here.
        nuc_ref[...] = (jnp.dot(h1, w2_ref[...],
                                preferred_element_type=jnp.float32)
                        + b2_ref[...])


def attribute_predictor_forward(x_bcs, w_enc_t, b_enc, w_heads, b_heads, w2, b2,
                                *, s_pad, tile, chunk, n_full, rem):
    """x_bcs: (B, C, H*W) image in (reshaped) NCHW layout, compute dtype."""
    B, C, HW = x_bcs.shape
    D = w_enc_t.shape[0]
    w_tot = w_heads.shape[1]
    h1_dim, n_pad = w2.shape

    assert HW % tile == 0, "tile must divide H*W"
    n_steps = HW // tile
    inv_hw = 1.0 / float(HW)

    kernel = functools.partial(_fused_kernel, s_pad=s_pad, inv_hw=inv_hw,
                               chunk=chunk, n_full=n_full, rem=rem)
    const = lambda b, s: (0, 0)   # constant index map -> weights stay VMEM-resident

    grid_spec = pltpu.PrefetchScalarGridSpec(
        num_scalar_prefetch=0,
        grid=(B, n_steps),
        in_specs=[
            pl.BlockSpec((None, C, tile), lambda b, s: (b, 0, s)),  # image tile
            pl.BlockSpec((D, C), const),            # encoder weight (pre-transposed)
            pl.BlockSpec((D, 1), const),            # encoder bias
            pl.BlockSpec((D, w_tot), const),        # fused head weight
            pl.BlockSpec((1, w_tot), const),        # fused head bias
            pl.BlockSpec((h1_dim, n_pad), const),   # nucleus layer-2 weight
            pl.BlockSpec((1, n_pad), const),        # nucleus layer-2 bias
        ],
        out_specs=(
            pl.BlockSpec((None, 1, s_pad), lambda b, s: (b, 0, 0)),
            pl.BlockSpec((None, 1, n_pad), lambda b, s: (b, 0, 0)),
        ),
        scratch_shapes=[pltpu.VMEM((D, 1), jnp.float32)],
    )

    simple3, nuc3 = pl.pallas_call(
        kernel,
        out_shape=(jax.ShapeDtypeStruct((B, 1, s_pad), jnp.float32),
                   jax.ShapeDtypeStruct((B, 1, n_pad), jnp.float32)),
        grid_spec=grid_spec,
        compiler_params=pltpu.CompilerParams(
            dimension_semantics=("parallel", "arbitrary"),
            vmem_limit_bytes=_VMEM_LIMIT_BYTES),
    )(x_bcs, w_enc_t, b_enc, w_heads, b_heads, w2, b2)

    return simple3.reshape(B, s_pad), nuc3.reshape(B, n_pad)


class AttributePredictorPallas:
    def __init__(self, attribute_sizes, image_encoder_output_dim,
                 nucleus_shape_index, dropout_rate, in_channels, key,
                 compute_dtype=jnp.bfloat16,
                 img_buffer_budget_bytes=None, chunk=None):
        if not 0 <= nucleus_shape_index < len(attribute_sizes):
            raise ValueError(
                f"nucleus_shape_index {nucleus_shape_index} out of range for "
                f"{len(attribute_sizes)} attributes")
        self.attribute_sizes = list(attribute_sizes)
        self.nucleus_shape_index = nucleus_shape_index
        self.dropout_rate = dropout_rate   # identity in inference mode
        self.compute_dtype = jnp.dtype(compute_dtype)
        self.chunk = chunk
        self.in_channels = in_channels
        D = image_encoder_output_dim
        self.D = D

        keys = jax.random.split(key, len(attribute_sizes) + 1)
        k_enc, head_keys = keys[0], keys[1:]

        # Synthetic image encoder (the PyTorch module takes an injected encoder):
        # 1x1 conv (in_channels -> D) + ReLU + global average pool.
        # Stored pre-transposed (D, C) and in the streaming compute dtype so the
        # kernel contracts the image tile in its natural layout.
        w_enc = (jax.random.normal(k_enc, (in_channels, D), jnp.float32)
                 * jnp.sqrt(2.0 / in_channels))
        self.w_enc_t = jnp.transpose(w_enc).astype(self.compute_dtype)   # (D, C)
        self.b_enc = jnp.zeros((D, 1), jnp.float32)

        simple_ws, simple_bs, self.simple_sizes = [], [], []
        w1 = b1 = w2 = b2 = None
        for i, size in enumerate(self.attribute_sizes):
            k = head_keys[i]
            if i == nucleus_shape_index:
                k1, k2, k3 = jax.random.split(k, 3)
                # layer 1: PyTorch nn.Linear default init
                #   kaiming_uniform(a=sqrt(5)) -> U(-1/sqrt(fan_in), 1/sqrt(fan_in))
                bound = 1.0 / float(D) ** 0.5
                w1 = jax.random.uniform(k1, (D, 256), jnp.float32, -bound, bound)
                b1 = jax.random.uniform(k3, (1, 256), jnp.float32, -bound, bound)
                # layer 2: kaiming_normal_(nonlinearity='relu'), zero bias
                w2 = (jax.random.normal(k2, (256, size), jnp.float32)
                      * jnp.sqrt(2.0 / 256.0))
                b2 = jnp.zeros((1, size), jnp.float32)
                self.nuc_size = size
            else:
                # kaiming_normal_(nonlinearity='relu'), zero bias
                w = (jax.random.normal(k, (D, size), jnp.float32)
                     * jnp.sqrt(2.0 / D))
                simple_ws.append(w)
                simple_bs.append(jnp.zeros((1, size), jnp.float32))
                self.simple_sizes.append(size)

        # --- fuse all plain Linear heads + nucleus layer 1, pad lane-dense ---
        s_total = sum(self.simple_sizes)
        self.s_pad = _round_up(max(s_total, 1), _LANE_PAD)
        if simple_ws:
            ws = jnp.concatenate(simple_ws, axis=1)          # (D, S_total)
            bs = jnp.concatenate(simple_bs, axis=1)          # (1, S_total)
        else:
            ws = jnp.zeros((D, 0), jnp.float32)
            bs = jnp.zeros((1, 0), jnp.float32)
        ws = jnp.pad(ws, ((0, 0), (0, self.s_pad - s_total)))
        bs = jnp.pad(bs, ((0, 0), (0, self.s_pad - s_total)))
        self.w_heads = jnp.concatenate([ws, w1], axis=1)     # (D, s_pad + 256)
        self.b_heads = jnp.concatenate([bs, b1], axis=1)     # (1, s_pad + 256)

        self.n_pad = _round_up(self.nuc_size, _LANE_PAD)
        self.w2 = jnp.pad(w2, ((0, 0), (0, self.n_pad - self.nuc_size)))
        self.b2 = jnp.pad(b2, ((0, 0), (0, self.n_pad - self.nuc_size)))

        # --- image-tile VMEM budget: what remains of the per-kernel limit after
        # the (double-buffered) resident weights and a slack allowance ---------
        cbytes = self.compute_dtype.itemsize
        w_tot = self.w_heads.shape[1]
        weights_vmem = (
            _padded_bytes_2d(D, in_channels, cbytes) +
            _padded_bytes_2d(D, 1, 4) +
            _padded_bytes_2d(D, w_tot, 4) +
            _padded_bytes_2d(1, w_tot, 4) +
            _padded_bytes_2d(256, self.n_pad, 4) +
            _padded_bytes_2d(1, self.n_pad, 4))
        if img_buffer_budget_bytes is None:
            img_buffer_budget_bytes = (
                _VMEM_LIMIT_BYTES - _VMEM_SLACK_BYTES - 2 * weights_vmem) // 2
            img_buffer_budget_bytes = int(min(
                _MAX_IMG_BUFFER_BYTES,
                max(_MIN_IMG_BUFFER_BYTES, img_buffer_budget_bytes)))
        self.img_buffer_budget_bytes = img_buffer_budget_bytes

    def __call__(self, x_nchw):
        B, C, H, W = x_nchw.shape
        HW = H * W
        # NCHW -> (B, C, H*W): a free reshape (no transpose, no extra HBM pass).
        # bf16 cast halves the HBM bytes the mem-bound kernel streams (ideally
        # the upstream producer already emits bf16).
        x = x_nchw.reshape(B, C, HW).astype(self.compute_dtype)

        tile, chunk, n_full, rem = _plan_spatial_tiling(
            HW, C, self.compute_dtype.itemsize, self.D,
            self.img_buffer_budget_bytes, self.chunk)

        simple_out, nuc_out = attribute_predictor_forward(
            x, self.w_enc_t, self.b_enc, self.w_heads, self.b_heads,
            self.w2, self.b2, s_pad=self.s_pad,
            tile=tile, chunk=chunk, n_full=n_full, rem=rem)

        # Slice the padded, fused outputs back into per-attribute logits,
        # preserving the original ordering of attribute_sizes.
        outputs = []
        off = 0
        it = iter(self.simple_sizes)
        for i, size in enumerate(self.attribute_sizes):
            if i == self.nucleus_shape_index:
                outputs.append(nuc_out[:, :size])
            else:
                s = next(it)
                outputs.append(simple_out[:, off:off + s])
                off += s
        return outputs


if __name__ == "__main__":
    key = jax.random.PRNGKey(0)
    k_x, k_params = jax.random.split(key)

    B, C, H, W = 2, 4, 16, 16
    attribute_sizes = [3, 5, 4]
    nucleus_shape_index = 1
    image_encoder_output_dim = 32
    dropout_rate = 0.1

    x = jax.random.normal(k_x, (B, C, H, W), jnp.float32)

    model = AttributePredictorPallas(
        attribute_sizes=attribute_sizes,
        image_encoder_output_dim=image_encoder_output_dim,
        nucleus_shape_index=nucleus_shape_index,
        dropout_rate=dropout_rate,
        in_channels=C,
        key=k_params,
        compute_dtype=jnp.bfloat16,
        # Tiny overrides so the demo exercises >1 spatial grid step and the
        # in-kernel chunk loop; real use leaves these None (budget-driven).
        img_buffer_budget_bytes=4096,
        chunk=128,
    )

    outputs = jax.block_until_ready(model(x))

    # shape / dtype checks (matches the PyTorch module's list of logits)
    assert [o.shape for o in outputs] == [(B, s) for s in attribute_sizes]
    assert all(o.dtype == jnp.float32 for o in outputs)

    # numerical check against a pure-JAX reference of the same forward math
    # (inputs rounded to the same bf16 the kernel streams)
    x_q = x.astype(model.compute_dtype).astype(jnp.float32)
    w_enc_f32 = jnp.transpose(model.w_enc_t.astype(jnp.float32))       # (C, D)
    b_enc_row = jnp.transpose(model.b_enc)                             # (1, D)
    xh = jnp.transpose(x_q, (0, 2, 3, 1)).reshape(B, H * W, C)
    feat = jnp.mean(jnp.maximum(xh @ w_enc_f32 + b_enc_row, 0.0), axis=1)
    g = feat @ model.w_heads + model.b_heads
    simple_ref = g[:, :model.s_pad]
    h1 = jnp.maximum(g[:, model.s_pad:], 0.0)
    nuc_ref = h1 @ model.w2 + model.b2
    ref_outputs, off = [], 0
    it = iter(model.simple_sizes)
    for i, size in enumerate(attribute_sizes):
        if i == nucleus_shape_index:
            ref_outputs.append(nuc_ref[:, :size])
        else:
            s = next(it)
            ref_outputs.append(simple_ref[:, off:off + s])
            off += s
    for got, want in zip(outputs, ref_outputs):
        assert jnp.allclose(got, want, atol=2e-2, rtol=2e-2), (
            float(jnp.max(jnp.abs(got - want))))

    print("KERNEL_OK")
</pallas_src>

<mosaic_0001>
module attributes {stable_mosaic.version = 11 : i64} {
  func.func @_fused_kernel(%arg0: i32, %arg1: i32, %arg2: memref<1x4x128xbf16, #tpu.memory_space<vmem>>, %arg3: memref<32x4xbf16, #tpu.memory_space<vmem>>, %arg4: memref<32x1xf32, #tpu.memory_space<vmem>>, %arg5: memref<32x384xf32, #tpu.memory_space<vmem>>, %arg6: memref<1x384xf32, #tpu.memory_space<vmem>>, %arg7: memref<256x128xf32, #tpu.memory_space<vmem>>, %arg8: memref<1x128xf32, #tpu.memory_space<vmem>>, %arg9: memref<1x1x128xf32, #tpu.memory_space<vmem>>, %arg10: memref<1x1x128xf32, #tpu.memory_space<vmem>>, %arg11: memref<32x1xf32, #tpu.memory_space<vmem>>) attributes {dimension_semantics = [#tpu.dimension_semantics<parallel>, #tpu.dimension_semantics<arbitrary>], iteration_bounds = array<i64: 2, 2>, scalar_prefetch = 0 : i64, scratch_operands = 1 : i64, tpu.core_type = #tpu.core_type<tc>, window_params = [{transform_indices = @transform_0, window_bounds = array<i64: 1, 4, 128>}, {pipeline_mode = #tpu.pipeline_mode<synchronous>, transform_indices = @transform_1, window_bounds = array<i64: 32, 4>}, {pipeline_mode = #tpu.pipeline_mode<synchronous>, transform_indices = @transform_2, window_bounds = array<i64: 32, 1>}, {pipeline_mode = #tpu.pipeline_mode<synchronous>, transform_indices = @transform_3, window_bounds = array<i64: 32, 384>}, {pipeline_mode = #tpu.pipeline_mode<synchronous>, transform_indices = @transform_4, window_bounds = array<i64: 1, 384>}, {pipeline_mode = #tpu.pipeline_mode<synchronous>, transform_indices = @transform_5, window_bounds = array<i64: 256, 128>}, {pipeline_mode = #tpu.pipeline_mode<synchronous>, transform_indices = @transform_6, window_bounds = array<i64: 1, 128>}, {transform_indices = @transform_7, window_bounds = array<i64: 1, 1, 128>}, {transform_indices = @transform_8, window_bounds = array<i64: 1, 1, 128>}]} {
    %c0_i32 = arith.constant 0 : i32
    %0 = arith.cmpi eq, %arg1, %c0_i32 : i32
    %1 = arith.extui %0 : i1 to i32
    %c0_i32_0 = arith.constant 0 : i32
    %2 = arith.cmpi ne, %1, %c0_i32_0 : i32
    scf.if %2 {
      %cst_16 = arith.constant 0.000000e+00 : f32
      %25 = vector.broadcast %cst_16 : f32 to vector<32x1xf32>
      %c0_17 = arith.constant 0 : index
      %c0_18 = arith.constant 0 : index
      %26 = vector.load %arg11[%c0_17, %c0_18] : memref<32x1xf32, #tpu.memory_space<vmem>>, vector<32x1xf32>
      tpu.vector_store %arg11[%c0_17, %c0_18], %25 {strides = array<i32>} : memref<32x1xf32, #tpu.memory_space<vmem>>, vector<32x1xf32>,
    } else {
    }
    %cst = arith.constant 0.000000e+00 : f32
    %3 = vector.broadcast %cst : f32 to vector<32x1xf32>
    %c0_i32_1 = arith.constant 0 : i32
    %c128_i32 = arith.constant 128 : i32
    %4 = arith.muli %c0_i32_1, %c128_i32 : i32
    %5 = tpu.assume_multiple %4, 128 : i32
    %c0 = arith.constant 0 : index
    %c0_2 = arith.constant 0 : index
    %6 = arith.index_cast %5 : i32 to index
    %7 = vector.load %arg2[%c0, %c0_2, %6] : memref<1x4x128xbf16, #tpu.memory_space<vmem>>, vector<1x4x128xbf16>
    %8 = vector.shape_cast %7 : vector<1x4x128xbf16> to vector<4x128xbf16>
    %c0_3 = arith.constant 0 : index
    %c0_4 = arith.constant 0 : index
    %9 = vector.load %arg3[%c0_3, %c0_4] : memref<32x4xbf16, #tpu.memory_space<vmem>>, vector<32x4xbf16>
    %cst_5 = arith.constant dense<0.000000e+00> : vector<32x128xf32>
    %10 = tpu.matmul %9, %8, %cst_5 {dimension_numbers = #tpu.dot_dimension_numbers<[1], [0], [0], [1], [0, 0, 1, 1], [], []>} : vector<32x4xbf16>, vector<4x128xbf16>, vector<32x128xf32> -> vector<32x128xf32>
    %c0_6 = arith.constant 0 : index
    %c0_7 = arith.constant 0 : index
    %11 = vector.load %arg4[%c0_6, %c0_7] : memref<32x1xf32, #tpu.memory_space<vmem>>, vector<32x1xf32>
    %12 = vector.broadcast %11 : vector<32x1xf32> to vector<32x128xf32>
    %13 = arith.addf %10, %12 : vector<32x128xf32>
    %cst_8 = arith.constant 0.000000e+00 : f32
    %14 = vector.broadcast %cst_8 : f32 to vector<32x128xf32>
    %15 = arith.maximumf %13, %14 : vector<32x128xf32>
    %cst_9 = arith.constant dense<0.000000e+00> : vector<32xf32>
    %16 = vector.multi_reduction <add>, %15, %cst_9 [1] : vector<32x128xf32> to vector<32xf32>
    %17 = vector.shape_cast %16 : vector<32xf32> to vector<32x1xf32>
    %18 = arith.addf %3, %17 : vector<32x1xf32>
    %c1_i32 = arith.constant 1 : i32
    %c0_10 = arith.constant 0 : index
    %c0_11 = arith.constant 0 : index
    %19 = vector.load %arg11[%c0_10, %c0_11] : memref<32x1xf32, #tpu.memory_space<vmem>>, vector<32x1xf32>
    %20 = arith.addf %19, %18 : vector<32x1xf32>
    %c0_12 = arith.constant 0 : index
    %c0_13 = arith.constant 0 : index
    %21 = vector.load %arg11[%c0_12, %c0_13] : memref<32x1xf32, #tpu.memory_space<vmem>>, vector<32x1xf32>
    tpu.vector_store %arg11[%c0_12, %c0_13], %20 {strides = array<i32>} : memref<32x1xf32, #tpu.memory_space<vmem>>, vector<32x1xf32>,
    %c1_i32_14 = arith.constant 1 : i32
    %22 = arith.cmpi eq, %arg1, %c1_i32_14 : i32
    %23 = arith.extui %22 : i1 to i32
    %c0_i32_15 = arith.constant 0 : i32
    %24 = arith.cmpi ne, %23, %c0_i32_15 : i32
    scf.if %24 {
      %c0_16 = arith.constant 0 : index
      %c0_17 = arith.constant 0 : index
      %25 = vector.load %arg11[%c0_16, %c0_17] : memref<32x1xf32, #tpu.memory_space<vmem>>, vector<32x1xf32>
      %cst_18 = arith.constant 3.906250e-03 : f32
      %26 = vector.broadcast %cst_18 : f32 to vector<32x1xf32>
      %27 = arith.mulf %25, %26 : vector<32x1xf32>
      %c0_19 = arith.constant 0 : index
      %c0_20 = arith.constant 0 : index
      %28 = vector.load %arg5[%c0_19, %c0_20] : memref<32x384xf32, #tpu.memory_space<vmem>>, vector<32x384xf32>
      %cst_21 = arith.constant dense<0.000000e+00> : vector<1x384xf32>
      %29 = tpu.matmul %27, %28, %cst_21 {dimension_numbers = #tpu.dot_dimension_numbers<[0], [0], [1], [1], [0, 1, 1, 1], [], []>} : vector<32x1xf32>, vector<32x384xf32>, vector<1x384xf32> -> vector<1x384xf32>
      %c0_22 = arith.constant 0 : index
      %c0_23 = arith.constant 0 : index
      %30 = vector.load %arg6[%c0_22, %c0_23] : memref<1x384xf32, #tpu.memory_space<vmem>>, vector<1x384xf32>
      %31 = arith.addf %29, %30 : vector<1x384xf32>
      %32 = vector.extract_strided_slice %31 {offsets = [0, 0], sizes = [1, 128], strides = [1, 1]} : vector<1x384xf32> to vector<1x128xf32>
      %c0_24 = arith.constant 0 : index
      %c0_25 = arith.constant 0 : index
      %c0_26 = arith.constant 0 : index
      %33 = vector.load %arg9[%c0_24, %c0_25, %c0_26] : memref<1x1x128xf32, #tpu.memory_space<vmem>>, vector<1x1x128xf32>
      %34 = vector.shape_cast %33 : vector<1x1x128xf32> to vector<1x128xf32>
      %35 = vector.shape_cast %32 : vector<1x128xf32> to vector<1x1x128xf32>
      tpu.vector_store %arg9[%c0_24, %c0_25, %c0_26], %35 {strides = array<i32>} : memref<1x1x128xf32, #tpu.memory_space<vmem>>, vector<1x1x128xf32>,
      %36 = vector.extract_strided_slice %31 {offsets = [0, 128], sizes = [1, 256], strides = [1, 1]} : vector<1x384xf32> to vector<1x256xf32>
      %cst_27 = arith.constant 0.000000e+00 : f32
      %37 = vector.broadcast %cst_27 : f32 to vector<1x256xf32>
      %38 = arith.maximumf %36, %37 : vector<1x256xf32>
      %c0_28 = arith.constant 0 : index
      %c0_29 = arith.constant 0 : index
      %39 = vector.load %arg7[%c0_28, %c0_29] : memref<256x128xf32, #tpu.memory_space<vmem>>, vector<256x128xf32>
      %cst_30 = arith.constant dense<0.000000e+00> : vector<1x128xf32>
      %40 = tpu.matmul %38, %39, %cst_30 {dimension_numbers = #tpu.dot_dimension_numbers<[1], [0], [0], [1], [0, 0, 1, 1], [], []>} : vector<1x256xf32>, vector<256x128xf32>, vector<1x128xf32> -> vector<1x128xf32>
      %c0_31 = arith.constant 0 : index
      %c0_32 = arith.constant 0 : index
      %41 = vector.load %arg8[%c0_31, %c0_32] : memref<1x128xf32, #tpu.memory_space<vmem>>, vector<1x128xf32>
      %42 = arith.addf %40, %41 : vector<1x128xf32>
      %c0_33 = arith.constant 0 : index
      %c0_34 = arith.constant 0 : index
      %c0_35 = arith.constant 0 : index
      %43 = vector.load %arg10[%c0_33, %c0_34, %c0_35] : memref<1x1x128xf32, #tpu.memory_space<vmem>>, vector<1x1x128xf32>
      %44 = vector.shape_cast %43 : vector<1x1x128xf32> to vector<1x128xf32>
      %45 = vector.shape_cast %42 : vector<1x128xf32> to vector<1x1x128xf32>
      tpu.vector_store %arg10[%c0_33, %c0_34, %c0_35], %45 {strides = array<i32>} : memref<1x1x128xf32, #tpu.memory_space<vmem>>, vector<1x1x128xf32>,
    } else {
    }
    return
  }
  func.func @transform_0(%arg0: i32, %arg1: i32) -> (i32, i32, i32) {
    %c0_i32 = arith.constant 0 : i32
    %c0_i32_0 = arith.constant 0 : i32
    return %arg0, %c0_i32, %arg1 : i32, i32, i32
  }
  func.func @transform_1(%arg0: i32, %arg1: i32) -> (i32, i32) {
    %c0_i32 = arith.constant 0 : i32
    %c0_i32_0 = arith.constant 0 : i32
    %c0_i32_1 = arith.constant 0 : i32
    return %c0_i32, %c0_i32_0 : i32, i32
  }
  func.func @transform_2(%arg0: i32, %arg1: i32) -> (i32, i32) {
    %c0_i32 = arith.constant 0 : i32
    %c0_i32_0 = arith.constant 0 : i32
    %c0_i32_1 = arith.constant 0 : i32
    return %c0_i32, %c0_i32_0 : i32, i32
  }
  func.func @transform_3(%arg0: i32, %arg1: i32) -> (i32, i32) {
    %c0_i32 = arith.constant 0 : i32
    %c0_i32_0 = arith.constant 0 : i32
    %c0_i32_1 = arith.constant 0 : i32
    return %c0_i32, %c0_i32_0 : i32, i32
  }
  func.func @transform_4(%arg0: i32, %arg1: i32) -> (i32, i32) {
    %c0_i32 = arith.constant 0 : i32
    %c0_i32_0 = arith.constant 0 : i32
    %c0_i32_1 = arith.constant 0 : i32
    return %c0_i32, %c0_i32_0 : i32, i32
  }
  func.func @transform_5(%arg0: i32, %arg1: i32) -> (i32, i32) {
    %c0_i32 = arith.constant 0 : i32
    %c0_i32_0 = arith.constant 0 : i32
    %c0_i32_1 = arith.constant 0 : i32
    return %c0_i32, %c0_i32_0 : i32, i32
  }
  func.func @transform_6(%arg0: i32, %arg1: i32) -> (i32, i32) {
    %c0_i32 = arith.constant 0 : i32
    %c0_i32_0 = arith.constant 0 : i32
    %c0_i32_1 = arith.constant 0 : i32
    return %c0_i32, %c0_i32_0 : i32, i32
  }
  func.func @transform_7(%arg0: i32, %arg1: i32) -> (i32, i32, i32) {
    %c0_i32 = arith.constant 0 : i32
    %c0_i32_0 = arith.constant 0 : i32
    %c0_i32_1 = arith.constant 0 : i32
    return %arg0, %c0_i32, %c0_i32_0 : i32, i32, i32
  }
  func.func @transform_8(%arg0: i32, %arg1: i32) -> (i32, i32, i32) {
    %c0_i32 = arith.constant 0 : i32
    %c0_i32_0 = arith.constant 0 : i32
    %c0_i32_1 = arith.constant 0 : i32
    return %arg0, %c0_i32, %c0_i32_0 : i32, i32, i32
  }
}

</mosaic_0001>

<bundles_post_ra>
// kernel: tpu_custom_call.1
= control target key start
LH: loop header
LB: loop body
LE: loop exit
PB: predicated region body
PF: predicated region fallthrough
CT: control target
= control target key end

     0   :  { %14 = vsyncpa [#allocation4], 0  ;;  %s1422_s0 = inlined_call_operand.vmem [shape: bf16[2,4,256], index: 0, kind: input, shape index: {}]   ;;  %s1423_s1 = inlined_call_operand.vmem [shape: bf16[32,4], index: 1, kind: input, shape index: {}]   ;;  %s1424_s2 = inlined_call_operand.vmem [shape: f32[32,1], index: 2, kind: input, shape index: {}]   ;;  %s1425_s3 = inlined_call_operand.hbm [shape: f32[32,384], index: 3, kind: input, shape index: {}]   ;;  %s1426_s4 = inlined_call_operand.vmem [shape: f32[1,384], index: 4, kind: input, shape index: {}]   ;;  %s1427_s5 = inlined_call_operand.hbm [shape: f32[256,128], index: 5, kind: input, shape index: {}]   ;;  %s1428_s6 = inlined_call_operand.vmem [shape: f32[1,128], index: 6, kind: input, shape index: {}]   ;;  %s1429_s7 = inlined_call_operand.hbm [shape: f32[2,1,128], index: 7, kind: output, shape index: {0}]   ;;  %s1430_s8 = inlined_call_operand.hbm [shape: f32[2,1,128], index: 8, kind: output, shape index: {1}]  }
   0x1   :  { %15 = vsyncpa [#allocation7], 0 }
   0x2   :  { %16 = vsyncpa [#allocation5], 0 }
   0x3   :  { %18 = vsyncpa [#allocation5 + $0x1], 0 }
   0x4   :  { %19 = vsyncpa [#allocation10], 0 }
   0x5   :  { %21 = vsyncpa [#allocation10 + $0x1], 0  ;;  %s1221_s27 = smov 0   ;;  %s1223_s28 = smov 0  }
   0x6   :  { %s1225_s29 = smov 0   ;;  %s1227_s30 = smov 0  }
   0x7   :  { %s1229_s9 = smov 0   ;;  %s1231_s10 = smov 0  }
   0x8   :  { %s1233_s11 = smov 0   ;;  %s1235_s12 = smov 0  }
   0x9 LB: > { %1435 = sst [smem:[#allocation15_spill]] %s1158_s10  ;;  %s835_s13 = sadd.s32 4294967295, %s1166_s12   ;;  %s1166_s12 = sphi %s1235_s12, %s27_s12   ;;  %s1162_s11 = sphi %s1233_s11, %s1448_s11   ;;  %s1158_s10 = sphi %s1231_s10, %s1447_s10   ;;  %s1154_s9 = sphi %s1229_s9, %s1446_s9   ;;  %s1150_s30 = sphi %s1227_s30, %s1445_s30   ;;  %s1146_s29 = sphi %s1225_s29, %s1451_s29   ;;  %s1142_s28 = sphi %s1223_s28, %s1450_s28   ;;  %s1138_s27 = sphi %s1221_s27, %s1449_s27  }
   0xa   : > { %1436 = sst [smem:[#allocation16_spill]] %s1162_s11  ;;  %s836_s14 = sadd.s32 4294967294, %s1166_s12  }
   0xb   : > { %s36_s15 = sadd.s32 1, %s1158_s10  ;;  %s39_s16 = sadd.s32 1, %s1162_s11 }
   0xc   : > { %p37_p0 = scmp.ge.s32.totalorder %s36_s15, 2  ;;  %s200_s17 = sadd.s32 1, %s1146_s29 }
   0xd   : > { %p210_p1 = scmp.ne.s32.totalorder %s1146_s29, %s1142_s28  ;;  %p211_p2 = scmp.eq.s32.totalorder %s835_s13, 3 }
   0xe   : > { %s1453_s15 = smov (%p37_p0, %s36_s15), 0  ;;  %s1455_s16 = smov (!%p37_p0, %s39_s16), %s1162_s11 }
   0xf   : > { %1437 = sst [smem:[#allocation17_spill]] %s1453_s15  ;;  %p1271_p3 = por %p211_p2, %p210_p1 }
  0x10   : > { %p216_p4 = scmp.ne.s32.totalorder %s1142_s28, %s1138_s27  ;;  %p41_p5 = scmp.ge.s32.totalorder %s1455_s16, 2 }
  0x11   : > { %p217_p6 = scmp.eq.s32.totalorder %s836_s14, 3  ;;  %p837_p7 = scmp.ge.s32.totalorder %s1166_s12, 1 }
  0x12   : > { %p250_p8 = scmp.lt.s32.totalorder %s1166_s12, 5  ;;  %s1457_s16 = smov (%p41_p5, %s1455_s16), 0 }
  0x13   : > { %1439 = sst [smem:[#allocation18_spill]] %s1457_s16  ;;  %p1281_p9 = por %p217_p6, %p216_p4 }
  0x14   : > { %p1285_p10 = pnand %p837_p7, %p250_p8  ;;  %s197_s21 = ssub.s32 %s1162_s11, %s1457_s16 }
  0x15   : > { %s1440_s19 = scalar_select %p1281_p9, 1, 0 }
  0x16   : > { %p198_p11 = scmp.eq.s32.totalorder %s197_s21, 0  ;;  %p878_p12 = pneg %p1285_p10 }
  0x17   : > { %1441 = sst [smem:[#allocation19_spill]] %s1440_s19  ;;  %p1293_p13 = scmp.eq.s32.totalorder %s835_s13, 0 }
  0x18   : > { %s267_s25 = sshll.u32 %s1425_s3, 4  ;;  %s1168_s14 = smov [#allocation3]   ;;  %s268_s25 = int_to_ptr.hbm [resolvable:$true] %s267_s25 }
  0x19   : > { %s1301_s26 = scalar_select %p198_p11, %s1146_s29, %s200_s17  }
  0x1a   : > { %s269_s15 = sshll.u32 %s1168_s14, 4  ;;  %p879_p0 = pnand %p1293_p13, %p878_p12  ;;  %s270_s15 = int_to_ptr.vmem [resolvable:$true] %s269_s15 }
  0x1b   : > { %s1169_s21 = smov 384   ;;  %s1170_s16 = smov 24  }
  0x1c   : > { %881 = dma.hbm_to_vmem [thread:$0]  (!%p879_p0), %s268_s25, 1536, %s270_s15, [#allocation4], %s1169_s21, %s1169_s21, %s1170_s16  }
  0x1d   : > { %s284_s10 = sshll.u32 %s1427_s5, 4  ;;  %s1171_s19 = smov [#allocation6]   ;;  %s285_s10 = int_to_ptr.hbm [resolvable:$true] %s284_s10 }
  0x1e   : > { %s286_s23 = sshll.u32 %s1171_s19, 4  ;;  %s1172_s24 = smov 128   ;;  %s287_s23 = int_to_ptr.vmem [resolvable:$true] %s286_s23 }
  0x1f   : > { %s1173_s17 = smov 8   ;;  %316 = sbr.rel (%p1285_p10) target bundleno = 790 (0x316), region = 48 }
  0x20   : > { %884 = dma.hbm_to_vmem [thread:$0]  (!%p879_p0), %s285_s10, 4096, %s287_s23, [#allocation7], %s1172_s24, %s1172_s24, %s1173_s17  }
  0x24   : > { %1121 = dma.done.wait (%p1293_p13), [#allocation4], 1536  }
  0x25   : > { %1123 = vsyncadd (%p1293_p13), [#allocation4], 4294965760 }
  0x26   : > { %1125 = dma.done.wait (%p1293_p13), [#allocation7], 4096  }
  0x27   : > { %1127 = vsyncadd (%p1293_p13), [#allocation7], 4294963200  ;;  %s1319_s10 = sand.u32 1, %s1142_s28   ;;  %p362_p1 = scmp.lt.s32.totalorder %s1154_s9, 1 }
  0x28   : > { %p364_p2 = scmp.lt.s32.totalorder %s1150_s30, 1  ;;  %s355_s21 = scalar_lea.vmem [#allocation8], %s1319_s10 }
  0x29   : > { %s363_s11 = scalar_select %p362_p1, %s1154_s9, 1 }
  0x2a   : > { %s365_s16 = scalar_select %p364_p2, %s1150_s30, 1 }
  0x2b   : > { %s844_s15 = sshll.u32 %s363_s11, 1  ;;  %s361_s13 = scalar_lea.vmem [#allocation9], %s1319_s10 }
  0x2c   : > { %s367_s19 = sadd.s32 %s844_s15, %s365_s16  ;;  %p846_p4 = scmp.ne.s32.totalorder %s1150_s30, 0 }
  0x2d   : > { %s845_s20 = sshll.u32 %s367_s19, 1 }
  0x2e   : > { %s369_s22 = scalar_lea.vmem %s1422_s0, %s845_s20  ;;  %374 = sbr.rel (%p846_p4) target bundleno = 56 (0x38), region = 60 }
  0x33   : > { %vm375_vm0 = vcmask 7168   ;;  %v1174_v0 = vmov 0.0  }
  0x34   : > { %376 = vst.msk [vmem:[#allocation2] sm:$0xff] %vm375_vm0, %v1174_v0 }
  0x35   : > { %377 = vst.msk [vmem:[#allocation2 + $0x8] sm:$0xff] %vm375_vm0, %v1174_v0 }
  0x36   : > { %378 = vst.msk [vmem:[#allocation2 + $0x10] sm:$0xff] %vm375_vm0, %v1174_v0 }
  0x37   : > { %379 = vst.msk [vmem:[#allocation2 + $0x18] sm:$0xff] %vm375_vm0, %v1174_v0 }
  0x38 PF: > { %v380_v1 = vld [vmem:[%s369_s22] sm:$0x3]  ;;  %vm426_vm1 = vcmask 1041408   ;;  %v864_v4 = vld [vmem:[%s1423_s1 + $0x8] sm:$0xff]  ;;  %v387_v5 = vld [vmem:[%s1424_s2 + $0x10] sm:$0xff]  ;;  %vm419_vm2 = vcmask 31744  }
  0x39   : > { %v863_v2 = vld [vmem:[%s1423_s1] sm:$0xff]  ;;  %v428_v3 = vsel %vm426_vm1, %v380_v1, 0  ;;  %v1175_v7 = vmov 0   ;;  %v388_v8 = vld [vmem:[%s1424_s2 + $0x18] sm:$0xff]  ;;  %v386_v9 = vld [vmem:[%s1424_s2 + $0x8] sm:$0xff]  ;;  %vm473_vm3 = vcmask 7168  }
  0x3a   : > { %v385_v6 = vld [vmem:[%s1424_s2] sm:$0xff]  ;;  %437 = vmatpush.bf16.msra.mxu0 %v428_v3  ;;  %865 = vmatpush.bf16.msra.mxu1 %v428_v3  ;;  %p857_p5 = scmp.ne.s32.totalorder %s1150_s30, 1 }
  0x3b   : > { %971 = vset.pattern.permute.xlu1 %v1175_v7  ;;  %970 = vset.pattern.permute.xlu0 %v1175_v7  ;;  %v465_v27 = vld [vmem:[#allocation2] sm:$0xff] }
  0x3c   : > { %401 = vperm.xlu1 %971, %v387_v5   ;;  %391 = vperm.xlu0 %970, %v385_v6   ;;  %v466_v33 = vld [vmem:[#allocation2 + $0x8] sm:$0xff] }
  0x3d   : > { %855 = vmatmul.msk.bf16.vlgmr.msra.gmra.mxu0 %vm419_vm2, %v863_v2  ;;  %856 = vmatmul.msk.bf16.vlgmr.msra.gmra.mxu1 %vm419_vm2, %v864_v4  ;;  %v467_v26 = vld [vmem:[#allocation2 + $0x10] sm:$0xff] }
  0x3e   : > { %v468_v32 = vld [vmem:[#allocation2 + $0x18] sm:$0xff] }
  0x44   : > { %406 = vperm.xlu1 %971, %v388_v8   ;;  %396 = vperm.xlu0 %970, %v386_v9  }
  0xae   : > { %v402_v10 = vpop.permute.xlu1 %401  ;;  %v392_v11 = vpop.permute.xlu0 %391 }
  0xb6   : > { %v407_v18 = vpop.permute.xlu1 %406  ;;  %v397_v19 = vpop.permute.xlu0 %396 }
  0xba   : > { %v439_v12 = vpop.f32.mrf.mxu0  ;;  %v444_v13 = vpop.f32.mrf.mxu1 }
  0xbb   : > { %v445_v14 = vadd.f32 %v444_v13, %v402_v10  ;;  %v440_v15 = vadd.f32 %v439_v12, %v392_v11 }
  0xbd   : > { %v451_v16 = vmax.f32 %v445_v14, 0.0  ;;  %v449_v17 = vmax.f32 %v440_v15, 0.0 }
  0xbf   : > { %457 = vadd.xlane.f32.xlu0 %v451_v16  ;;  %453 = vadd.xlane.f32.xlu2 %v449_v17 }
  0xc2   : > { %v441_v20 = vpop.f32.mrf.mxu0  ;;  %v446_v21 = vpop.f32.mrf.mxu1 }
  0xc3   : > { %v442_v22 = vadd.f32 %v441_v20, %v397_v19  ;;  %v447_v23 = vadd.f32 %v446_v21, %v407_v18 }
  0xc5   : > { %v450_v24 = vmax.f32 %v442_v22, 0.0  ;;  %v452_v25 = vmax.f32 %v447_v23, 0.0 }
  0xc7   : > { %459 = vadd.xlane.f32.xlu1 %v452_v25  ;;  %455 = vadd.xlane.f32.xlu2 %v450_v24 }
 0x132   : > { %v458_v28 = vpop.xlane.xlu0 %457  ;;  %v454_v29 = vpop.xlane.xlu2 %453 }
 0x133   : > { %v471_v30 = vadd.f32 %v467_v26, %v458_v28  ;;  %v469_v31 = vadd.f32 %v465_v27, %v454_v29 }
 0x135   : > { %476 = vst.msk [vmem:[#allocation2 + $0x10] sm:$0xff] %vm473_vm3, %v471_v30 }
 0x136   : > { %474 = vst.msk [vmem:[#allocation2] sm:$0xff] %vm473_vm3, %v469_v31 }
 0x13a   : > { %v460_v34 = vpop.xlane.xlu1 %459  ;;  %v456_v35 = vpop.xlane.xlu2 %455  ;;  %481 = sbr.rel (%p857_p5) target bundleno = 762 (0x2fa), region = 64 }
 0x13b   : > { %v472_v36 = vadd.f32 %v468_v32, %v460_v34  ;;  %v470_v37 = vadd.f32 %v466_v33, %v456_v35 }
 0x13d   : > { %477 = vst.msk [vmem:[#allocation2 + $0x18] sm:$0xff] %vm473_vm3, %v472_v36 }
 0x13e   : > { %475 = vst.msk [vmem:[#allocation2 + $0x8] sm:$0xff] %vm473_vm3, %v470_v37 }
 0x13f   : > { %v482_v38 = vld [vmem:[#allocation2] sm:$0xff]  ;;  %v499_v40 = vld [vmem:[#allocation3 + $0x48] sm:$0xff]  ;;  %v501_v41 = vld [vmem:[#allocation3 + $0x58] sm:$0xff]  ;;  %vm542_vm4 = vcmask 261120  }
 0x140   : > { %v486_v39 = vmul.f32 0.00390625, %v482_v38  ;;  %558 = vmatpush.msra.mxu1 %v499_v40  ;;  %598 = vmatpush.msra.mxu2 %v501_v41  ;;  %v496_v42 = vld [vmem:[#allocation3 + $0x30] sm:$0xff]  ;;  %v498_v43 = vld [vmem:[#allocation3 + $0x40] sm:$0xff]  ;;  %v493_v44 = vld [vmem:[#allocation3 + $0x18] sm:$0xff] }
 0x141   : > { %v495_v45 = vld [vmem:[#allocation3 + $0x28] sm:$0xff]  ;;  %v490_v47 = vld [vmem:[#allocation3] sm:$0xff]  ;;  %v492_v48 = vld [vmem:[#allocation3 + $0x10] sm:$0xff] }
 0x142   : > { %503 = vxpose.xlu0.b32.start [1/4] (short) (narrow) %v486_v39, 8  ;;  %559 = vmatpush.msra.mxu1 %v496_v42  ;;  %v484_v50 = vld [vmem:[#allocation2 + $0x10] sm:$0xff]  ;;  %v497_v55 = vld [vmem:[#allocation3 + $0x38] sm:$0xff]  ;;  %v494_v56 = vld [vmem:[#allocation3 + $0x20] sm:$0xff] }
 0x143   : > { %599 = vmatpush.msra.mxu2 %v498_v43  ;;  %v488_v51 = vmul.f32 0.00390625, %v484_v50  ;;  %v500_v54 = vld [vmem:[#allocation3 + $0x50] sm:$0xff]  ;;  %v491_v57 = vld [vmem:[#allocation3 + $0x8] sm:$0xff]  ;;  %v640_v58 = vld [vmem:[#allocation6 + $0xf8] sm:$0xff] }
 0x144   : > { %560 = vmatpush.msra.mxu1 %v493_v44  ;;  %v485_v52 = vld [vmem:[#allocation2 + $0x18] sm:$0xff]  ;;  %v639_v60 = vld [vmem:[#allocation6 + $0xf0] sm:$0xff]  ;;  %662 = vmatpush.msra.mxu0 %v640_v58  ;;  %v638_v62 = vld [vmem:[#allocation6 + $0xe8] sm:$0xff] }
 0x145   : > { %v483_v46 = vld [vmem:[#allocation2 + $0x8] sm:$0xff]  ;;  %600 = vmatpush.msra.mxu2 %v495_v45  ;;  %v489_v53 = vmul.f32 0.00390625, %v485_v52  ;;  %v624_v59 = vld [vmem:[#allocation6 + $0x78] sm:$0xff]  ;;  %v623_v61 = vld [vmem:[#allocation6 + $0x70] sm:$0xff] }
 0x146   : > { %v487_v49 = vmul.f32 0.00390625, %v483_v46  ;;  %561 = vmatpush.msra.mxu1 %v490_v47  ;;  %642 = vmatpush.msra.mxu3 %v624_v59  ;;  %v622_v63 = vld [vmem:[#allocation6 + $0x68] sm:$0xff]  ;;  %v637_v0 = vld [vmem:[#allocation6 + $0xe0] sm:$0xff]  ;;  %v636_v2 = vld [vmem:[#allocation6 + $0xd8] sm:$0xff] }
 0x147   : > { %601 = vmatpush.msra.mxu2 %v492_v48  ;;  %663 = vmatpush.msra.mxu0 %v639_v60  ;;  %v621_v1 = vld [vmem:[#allocation6 + $0x60] sm:$0xff]  ;;  %v620_v3 = vld [vmem:[#allocation6 + $0x58] sm:$0xff]  ;;  %v635_v4 = vld [vmem:[#allocation6 + $0xd0] sm:$0xff] }
 0x148   : > { %578 = vmatpush.msrb.mxu1 %v500_v54  ;;  %643 = vmatpush.msra.mxu3 %v623_v61  ;;  %v619_v5 = vld [vmem:[#allocation6 + $0x50] sm:$0xff]  ;;  %v634_v6 = vld [vmem:[#allocation6 + $0xc8] sm:$0xff]  ;;  %v633_v8 = vld [vmem:[#allocation6 + $0xc0] sm:$0xff] }
 0x149   : > { %664 = vmatpush.msra.mxu0 %v638_v62  ;;  %v618_v7 = vld [vmem:[#allocation6 + $0x48] sm:$0xff]  ;;  %v617_v9 = vld [vmem:[#allocation6 + $0x40] sm:$0xff]  ;;  %v632_v10 = vld [vmem:[#allocation6 + $0xb8] sm:$0xff] }
 0x14a   : > { %504 = vxpose.xlu0.b32.cont [2/4] (short) (narrow) %v487_v49, 8  ;;  %579 = vmatpush.msrb.mxu1 %v497_v55  ;;  %v616_v11 = vld [vmem:[#allocation6 + $0x38] sm:$0xff]  ;;  %v631_v12 = vld [vmem:[#allocation6 + $0xb0] sm:$0xff]  ;;  %v630_v15 = vld [vmem:[#allocation6 + $0xa8] sm:$0xff] }
 0x14b   : > { %644 = vmatpush.msra.mxu3 %v622_v63  ;;  %665 = vmatpush.msra.mxu0 %v637_v0  ;;  %v615_v14 = vld [vmem:[#allocation6 + $0x30] sm:$0xff]  ;;  %v614_v16 = vld [vmem:[#allocation6 + $0x28] sm:$0xff]  ;;  %v629_v17 = vld [vmem:[#allocation6 + $0xa0] sm:$0xff] }
 0x14c   : > { %580 = vmatpush.msrb.mxu1 %v494_v56  ;;  %v613_v18 = vld [vmem:[#allocation6 + $0x20] sm:$0xff]  ;;  %v628_v19 = vld [vmem:[#allocation6 + $0x98] sm:$0xff]  ;;  %v627_v21 = vld [vmem:[#allocation6 + $0x90] sm:$0xff] }
 0x14d   : > { %645 = vmatpush.msra.mxu3 %v621_v1  ;;  %666 = vmatpush.msra.mxu0 %v636_v2  ;;  %v612_v20 = vld [vmem:[#allocation6 + $0x18] sm:$0xff]  ;;  %v611_v22 = vld [vmem:[#allocation6 + $0x10] sm:$0xff]  ;;  %v626_v23 = vld [vmem:[#allocation6 + $0x88] sm:$0xff] }
 0x14e   : > { %581 = vmatpush.msrb.mxu1 %v491_v57  ;;  %v610_v24 = vld [vmem:[#allocation6 + $0x8] sm:$0xff]  ;;  %v625_v25 = vld [vmem:[#allocation6 + $0x80] sm:$0xff] }
 0x14f   : > { %646 = vmatpush.msra.mxu3 %v620_v3  ;;  %667 = vmatpush.msra.mxu0 %v635_v4  ;;  %v609_v26 = vld [vmem:[#allocation6] sm:$0xff] }
 0x150   : > { %v502_v27 = vld [vmem:[%s1426_s4] sm:$0x7] }
 0x151   : > { %647 = vmatpush.msra.mxu3 %v619_v5  ;;  %668 = vmatpush.msra.mxu0 %v634_v6  ;;  %v536_v28 = vperm.slane %v502_v27, 0  ;;  %v538_v31 = vperm.slane %v502_v27, 2  ;;  %v537_v32 = vperm.slane %v502_v27, 1  ;;  %v641_v39 = vld [vmem:[%s1428_s6] sm:$0x1] }
 0x152   : > { %505 = vxpose.xlu0.b32.cont [3/4] (short) (narrow) %v488_v51, 8 }
 0x153   : > { %648 = vmatpush.msra.mxu3 %v618_v7  ;;  %669 = vmatpush.msra.mxu0 %v633_v8 }
 0x155   : > { %649 = vmatpush.msra.mxu3 %v617_v9  ;;  %670 = vmatpush.msra.mxu0 %v632_v10 }
 0x157   : > { %650 = vmatpush.msra.mxu3 %v616_v11  ;;  %671 = vmatpush.msra.mxu0 %v631_v12 }
 0x159   : > { %651 = vmatpush.msra.mxu3 %v615_v14  ;;  %672 = vmatpush.msra.mxu0 %v630_v15 }
 0x15a   : > { %506 = vxpose.xlu0.b32.end [4/4] (short) (narrow) %v489_v53, 8 }
 0x15b   : > { %652 = vmatpush.msra.mxu3 %v614_v16  ;;  %673 = vmatpush.msra.mxu0 %v629_v17 }
 0x15d   : > { %653 = vmatpush.msra.mxu3 %v613_v18  ;;  %674 = vmatpush.msra.mxu0 %v628_v19 }
 0x15f   : > { %654 = vmatpush.msra.mxu3 %v612_v20  ;;  %675 = vmatpush.msra.mxu0 %v627_v21 }
 0x161   : > { %655 = vmatpush.msra.mxu3 %v611_v22  ;;  %676 = vmatpush.msra.mxu0 %v626_v23 }
 0x163   : > { %656 = vmatpush.msra.mxu3 %v610_v24  ;;  %677 = vmatpush.msra.mxu0 %v625_v25 }
 0x165   : > { %657 = vmatpush.msra.mxu3 %v609_v26 }
 0x1e6   : > { %v519_v13 = vpop.trf.xlu0 }
 0x1e7   : > { %858 = vmatmul.msk.f32.vlgmr.msra.gmra.mxu1 %vm542_vm4, %v519_v13  ;;  %860 = vmatmul.msk.f32.vlgmr.msra.gmra.mxu2 %vm542_vm4, %v519_v13 }
 0x1ef   : > { %859 = vmatmul.msk.f32.vlgmr.msrb.gmra.mxu1 %vm542_vm4, %v519_v13 }
 0x264   : > { %v563_v29 = vpop.f32.mrf.mxu1 }
 0x265   : > { %v564_v30 = vadd.f32 %v563_v29, %v536_v28 }
 0x267   : > { %606 = vst [vmem:[%s355_s21] sm:$0x1] %v564_v30 }
 0x26a   : > { %v603_v33 = vpop.f32.mrf.mxu2 }
 0x26b   : > { %v604_v34 = vadd.f32 %v603_v33, %v538_v31 }
 0x26c   : > { %v583_v35 = vpop.f32.mrf.mxu1 }
 0x26d   : > { %v608_v36 = vmax.f32 %v604_v34, 0.0  ;;  %v584_v37 = vadd.f32 %v583_v35, %v537_v32 }
 0x26f   : > { %v607_v38 = vmax.f32 %v584_v37, 0.0  ;;  %678 = vmatmul.f32.vlgmr.msra.gmra.mxu0 %v608_v36 }
 0x271   : > { %658 = vmatmul.f32.vlgmr.msra.gmra.mxu3 %v607_v38 }
 0x2ec   : > { %v679_v42 = vpop.f32.mrf.mxu0 }
 0x2f4   : > { %v659_v40 = vpop.f32.mrf.mxu3 }
 0x2f5   : > { %v660_v41 = vadd.f32 %v659_v40, %v641_v39 }
 0x2f7   : > { %v680_v43 = vadd.f32 %v679_v42, %v660_v41 }
 0x2f9   : > { %682 = vst [vmem:[%s361_s13] sm:$0x1] %v680_v43 }
 0x2fa PF: > { %s696_s19 = scalar_lea.hbm %s1429_s7, %s1154_s9  ;;  %s698_s20 = sshll.u32 %s355_s21, 4  ;;  %s699_s20 = int_to_ptr.vmem [resolvable:$true] %s698_s20 }
 0x2fb   : > { %s700_s25 = sshll.u32 %s696_s19, 4  ;;  %s684_s14 = scalar_lea.sflag [#allocation5], %s1319_s10  ;;  %s701_s25 = int_to_ptr.hbm [resolvable:$true] %s700_s25 }
 0x2fc   : > { %s1046_s22 = sshra.s32 %s701_s25, 4  ;;  %s1052_s17 = scalar_lea.hbm %s1429_s7, 2  ;;  %s1047_s22 = int_to_ptr.hbm [resolvable:$true] %s1046_s22 }
 0x2fd   : > { %s1048_s23 = scalar_lea.hbm %s1047_s22, 1  ;;  %p1053_p10 = scmp.lt.s32.totalorder %s1047_s22, %s1429_s7 }
 0x2fe   : > { %p1049_p6 = scmp.ne.s32.totalorder %s1047_s22, %s1048_s23  ;;  %p1054_p11 = scmp.lt.s32.totalorder %s1052_s17, %s1048_s23 }
 0x300   : > { %p1050_p7 = pnand %p1049_p6, %p1271_p3  ;;  %p1055_p12 = por %p1054_p11, %p1053_p10 }
 0x302   : > { %p1051_p8 = pneg %p1050_p7 }
 0x304   : > { %p1056_p13 = pnand %p1055_p12, %p1051_p8 }
 0x306   : > { %1059 = shalt.err (!%p1056_p13)
}
 0x307   : > { %874 = dma.vmem_to_hbm [thread:$0]  (%p1271_p3), %s699_s20, 16, %s701_s25, %s684_s14  }
 0x308   : > { %s709_s19 = scalar_lea.hbm %s1430_s8, %s1154_s9  ;;  %s711_s30 = sshll.u32 %s361_s13, 4  ;;  %s712_s30 = int_to_ptr.vmem [resolvable:$true] %s711_s30 }
 0x309   : > { %s713_s24 = sshll.u32 %s709_s19, 4  ;;  %s688_s22 = scalar_lea.sflag [#allocation10], %s1319_s10  ;;  %s714_s24 = int_to_ptr.hbm [resolvable:$true] %s713_s24 }
 0x30a   : > { %s1074_s23 = sshra.s32 %s714_s24, 4  ;;  %s1080_s20 = scalar_lea.hbm %s1430_s8, 2  ;;  %s1075_s23 = int_to_ptr.hbm [resolvable:$true] %s1074_s23 }
 0x30b   : > { %s1076_s17 = scalar_lea.hbm %s1075_s23, 1  ;;  %p1081_p4 = scmp.lt.s32.totalorder %s1075_s23, %s1430_s8 }
 0x30c   : > { %p1077_p0 = scmp.ne.s32.totalorder %s1075_s23, %s1076_s17  ;;  %p1082_p5 = scmp.lt.s32.totalorder %s1080_s20, %s1076_s17 }
 0x30e   : > { %p1078_p1 = pnand %p1077_p0, %p1271_p3  ;;  %p1083_p6 = por %p1082_p5, %p1081_p4 }
 0x310   : > { %p1079_p2 = pneg %p1078_p1 }
 0x312   : > { %p1084_p7 = pnand %p1083_p6, %p1079_p2 }
 0x314   : > { %1087 = shalt.err (!%p1084_p7)
}
 0x315   : > { %875 = dma.vmem_to_hbm [thread:$0]  (%p1271_p3), %s712_s30, 16, %s714_s24, %s688_s22  }
 0x316 PF: > { %p896_p8 = scmp.ge.s32.totalorder %s1166_s12, 2  ;;  %s725_s10 = sand.u32 1, %s1138_s27  }
 0x317   : > { %s726_s13 = scalar_lea.sflag [#allocation5], %s725_s10 }
 0x318   : > { %p886_p10 = pnand %p896_p8, %p1281_p9 }
 0x31a   : > { %p887_p11 = pneg %p886_p10 }
 0x31c   : > { %1129 = dma.done.wait (%p887_p11), %s726_s13, 16  }
 0x31d   : > { %1131 = vsyncadd (%p887_p11), %s726_s13, 4294967280  ;;  %s735_s21 = scalar_lea.sflag [#allocation10], %s725_s10 }
 0x31e   : > { %1133 = dma.done.wait (%p887_p11), %s735_s21, 16  }
 0x31f   : > { %1135 = vsyncadd (%p887_p11), %s735_s21, 4294967280  ;;  %s27_s12 = sadd.s32 1, %s1166_s12   ;;  %s1445_s30 = sld [smem:[#allocation15_spill]] }
 0x320   : > { %p24_p12 = scmp.ge.s32.totalorder %s27_s12, 6   ;;  %s1446_s9 = sld [smem:[#allocation16_spill]] }
 0x321   : > { %s1447_s10 = sld [smem:[#allocation17_spill]]  ;;  %s1449_s27 = smov %s1142_s28 }
 0x322   : > { %s1448_s11 = sld [smem:[#allocation18_spill]]  ;;  %s1450_s28 = smov %s1146_s29 }
 0x323   : > { %s1451_s29 = smov %s1301_s26  ;;  %26 = sbr.rel (!%p24_p12) target bundleno = 9 (0x9), region = 117 }
 0x328   :  { %740 = vsyncpa [#allocation4], 1 }
 0x329   :  { %742 = vsyncpa [#allocation4 + $0x1], 1 }
 0x32a   :  { %743 = vsyncpa [#allocation7], 1 }
 0x32b   :  { %744 = vsyncpa [#allocation5], 1 }
 0x32c   :  { %746 = vsyncpa [#allocation5 + $0x1], 1 }
 0x32d   :  { %747 = vsyncpa [#allocation10], 1 }
 0x32e   :  { %749 = vsyncpa [#allocation10 + $0x1], 1 }

</bundles_post_ra>
